<compile_context>
chip_gen: v7x
topology: tpu7x:2x2x1
jax: 0.10.0
libtpu: 0.0.40
codegen_flags: <defaults>
</compile_context>

<pallas_src>
import functools

import numpy as np
import jax
import jax.numpy as jnp
from jax import lax
from jax.experimental import pallas as pl
from jax.experimental.pallas import tpu as pltpu


# --------------------------------------------------------------------------- helpers

def _dft_matrix(n):
    """Ortho-normalized DFT matrix F[j,k] = exp(-2*pi*i*j*k/n)/sqrt(n). Symmetric."""
    k = np.arange(n)
    return (np.exp(-2j * np.pi * np.outer(k, k) / n) / np.sqrt(n)).astype(np.complex64)


def _gauss_cmm(ar, ai, asum, br, bi, bsum):
    """Complex matmul (ar + i*ai) @ (br + i*bi) with 3 real MXU matmuls (Gauss trick).
    Relies on Mosaic's default (precise) f32 matmul lowering."""
    m1 = jnp.dot(ar, br, preferred_element_type=jnp.float32)
    m2 = jnp.dot(ai, bi, preferred_element_type=jnp.float32)
    m3 = jnp.dot(asum, bsum, preferred_element_type=jnp.float32)
    return m1 - m2, m3 - m1 - m2


def _vmem_capacity_bytes():
    try:
        return int(pltpu.get_tpu_info().vmem_capacity_bytes)
    except Exception:
        return 128 * 1024 * 1024  # v5e/v6e physical VMEM


def _vmem_estimate(CB, H, W, Wp, square):
    """Rough per-step VMEM footprint (double-buffered pipelined blocks + consts + temps)."""
    fb, nbuf = 4, 2
    io = nbuf * fb * (2 * H * W            # image block (real+imag planes)
                      + CB * 2 * H * W     # smaps block
                      + H * Wp             # mask block
                      + CB * 2 * H * Wp)   # output block
    consts = nbuf * fb * 3 * (H * H + (0 if square else W * Wp))
    temps = fb * 12 * H * Wp               # per-coil live temporaries inside the loop
    return io + consts + temps


def _pick_coil_block(C, H, W, Wp, square, budget):
    """Largest coil block that divides C, keeps blocks (8,128)-legal and fits the budget."""
    if (2 * H) % 8 != 0:
        return C  # block second-minor dim must then equal the full extent to stay legal
    best = 1
    for cand in range(1, min(C, 8) + 1):
        if C % cand == 0 and _vmem_estimate(cand, H, W, Wp, square) <= budget:
            best = cand
    return best


# --------------------------------------------------------------------------- kernel

def _mfwd_kernel(img_ref, smp_ref, msk_ref, fhr_ref, fhi_ref, fhs_ref, *rest,
                 CB, H, W, Wp, square):
    if square:
        (out_ref,) = rest
    else:
        fwr_ref, fwi_ref, fws_ref, out_ref = rest

    img = img_ref.at[0]      # (2H, W) view: rows [0,H) real, [H,2H) imag
    smp = smp_ref.at[0]      # (CB*2H, W) view, per-coil [real; imag] stacked along rows
    out = out_ref.at[0]      # (CB*2H, Wp) view, same per-coil layout
    mk = msk_ref[0]          # (H, Wp)

    ir = img[:H, :]
    ii = img[H:, :]

    fhr = fhr_ref[...]
    fhi = fhi_ref[...]
    fhs = fhs_ref[...]       # precomputed F_H.real + F_H.imag (hoisted out of the kernel)
    if square:
        fwr, fwi, fws = fhr, fhi, fhs
    else:
        fwr = fwr_ref[...]
        fwi = fwi_ref[...]
        fws = fws_ref[...]

    row_step = 2 * H
    aligned = (row_step % 8 == 0)

    def coil_body(c, carry):
        lo = c * row_step
        if aligned:
            lo = pl.multiple_of(lo, 8)
        sr = smp[pl.ds(lo, H), :]
        si = smp[pl.ds(lo + H, H), :]
        # coil image = image * smap (complex elementwise, VPU)
        xr = ir * sr - ii * si
        xi = ir * si + ii * sr
        # stage A: T = X @ F_W   ((H, W) @ (W, Wp), Gauss 3-mult complex matmul)
        tr, ti = _gauss_cmm(xr, xi, xr + xi, fwr, fwi, fws)
        # stage B: Y = F_H @ T   ((H, H) @ (H, Wp))
        # TODO(synk): F_H streams while the coil-varying T sits on the MXU-stationary side;
        # restructure only if the bundle dump shows weight-push stalls (small H, large CB).
        yr, yi = _gauss_cmm(fhr, fhi, fhs, tr, ti, tr + ti)
        # masked k-space, lane-dense stores (Wp is 128-aligned or the full extent)
        out[pl.ds(lo, H), :] = yr * mk
        out[pl.ds(lo + H, H), :] = yi * mk
        return carry

    lax.fori_loop(0, CB, coil_body, 0, unroll=(CB <= 4))


# --------------------------------------------------------------------------- wrapper

def multicoil_forward(image, mask, smaps):
    """Pallas equivalent of MulticoilForwardOp(center=False, coil_axis=-3,
    channel_dim_defined=True).forward(image, mask, smaps)."""
    B, C, H, W = smaps.shape
    Wp = W if W % 128 == 0 else ((W + 127) // 128) * 128
    square = (H == W) and (Wp == W)

    # ----- complex -> planar prep (single fused HBM pass per input) -----
    img = image[:, 0]                                                       # (B, H, W) complex
    img_ri = jnp.stack([jnp.real(img), jnp.imag(img)], axis=1)              # (B, 2, H, W)
    img_ri = img_ri.astype(jnp.float32).reshape(B, 2 * H, W)
    smp_ri = jnp.stack([jnp.real(smaps), jnp.imag(smaps)], axis=2)          # (B, C, 2, H, W)
    smp_ri = smp_ri.astype(jnp.float32).reshape(B, C * 2 * H, W)

    # ----- mask: keep un-broadcast over batch, pad columns to Wp -----
    m = jnp.asarray(mask, jnp.float32)
    if m.ndim == 4:          # (MB, 1, H, W)
        m = m.reshape(m.shape[0], H, W)
    elif m.ndim == 2:        # (H, W)
        m = m.reshape(1, H, W)
    MB = m.shape[0]
    if Wp != W:
        m = jnp.pad(m, ((0, 0), (0, 0), (0, Wp - W)))

    # ----- DFT constants (Gauss sum precomputed, F_W columns zero-padded to Wp) -----
    fh = _dft_matrix(H)
    fh_r = np.ascontiguousarray(fh.real.astype(np.float32))
    fh_i = np.ascontiguousarray(fh.imag.astype(np.float32))
    fh_s = fh_r + fh_i

    # ----- generation-aware VMEM budget and coil blocking -----
    budget = max(_vmem_capacity_bytes() - 16 * 1024 * 1024, 32 * 1024 * 1024)
    CB = _pick_coil_block(C, H, W, Wp, square, budget)
    n_cb = C // CB
    est = _vmem_estimate(CB, H, W, Wp, square)
    vmem_limit = int(min(budget, max(32 * 1024 * 1024, int(1.25 * est))))

    mask_idx = (lambda b, cb: (b, 0, 0)) if MB == B else (lambda b, cb: (0, 0, 0))

    in_specs = [
        pl.BlockSpec((1, 2 * H, W), lambda b, cb: (b, 0, 0)),           # image planes
        pl.BlockSpec((1, CB * 2 * H, W), lambda b, cb: (b, cb, 0)),     # smaps planes (CB coils)
        pl.BlockSpec((1, H, Wp), mask_idx),                             # mask
        pl.BlockSpec((H, H), lambda b, cb: (0, 0)),                     # F_H real
        pl.BlockSpec((H, H), lambda b, cb: (0, 0)),                     # F_H imag
        pl.BlockSpec((H, H), lambda b, cb: (0, 0)),                     # F_H real+imag
    ]
    args = [img_ri, smp_ri, m,
            jnp.asarray(fh_r), jnp.asarray(fh_i), jnp.asarray(fh_s)]

    if not square:
        fw = _dft_matrix(W)
        fw_pad = np.zeros((W, Wp), np.complex64)
        fw_pad[:, :W] = fw
        fw_r = fw_pad.real.astype(np.float32)
        fw_i = fw_pad.imag.astype(np.float32)
        fw_s = fw_r + fw_i
        args += [jnp.asarray(fw_r), jnp.asarray(fw_i), jnp.asarray(fw_s)]
        in_specs += [pl.BlockSpec((W, Wp), lambda b, cb: (0, 0)),
                     pl.BlockSpec((W, Wp), lambda b, cb: (0, 0)),
                     pl.BlockSpec((W, Wp), lambda b, cb: (0, 0))]

    out_specs = pl.BlockSpec((1, CB * 2 * H, Wp), lambda b, cb: (b, cb, 0))
    out_shape = jax.ShapeDtypeStruct((B, C * 2 * H, Wp), jnp.float32)

    kernel = functools.partial(_mfwd_kernel, CB=CB, H=H, W=W, Wp=Wp, square=square)

    out = pl.pallas_call(
        kernel,
        grid=(B, n_cb),
        in_specs=in_specs,
        out_specs=out_specs,
        out_shape=out_shape,
        compiler_params=pltpu.CompilerParams(
            dimension_semantics=("parallel", "parallel"),
            vmem_limit_bytes=vmem_limit),
    )(*args)

    # planar -> complex (single fused pass: slice padding + recombine)
    out = out.reshape(B, C, 2, H, Wp)
    k = lax.complex(out[:, :, 0, :, :W], out[:, :, 1, :, :W])
    return k.astype(jnp.complex64)


# --------------------------------------------------------------------------- demo / check

if __name__ == "__main__":
    def _reference(image, mask, smaps):
        coilimg = image[:, 0][:, None, :, :] * smaps
        return jnp.fft.fft2(coilimg, axes=(-2, -1), norm="ortho") * mask

    # Case 1: small shapes; W=16 exercises the lane-padding (Wp=128) path and a per-batch mask.
    B, C, H, W = 2, 4, 16, 16
    k1, k2, k3, k4, k5 = jax.random.split(jax.random.PRNGKey(0), 5)
    image = (jax.random.normal(k1, (B, 1, H, W))
             + 1j * jax.random.normal(k2, (B, 1, H, W))).astype(jnp.complex64)
    smaps = (jax.random.normal(k3, (B, C, H, W))
             + 1j * jax.random.normal(k4, (B, C, H, W))).astype(jnp.complex64)
    mask = (jax.random.uniform(k5, (B, 1, H, W)) > 0.5).astype(jnp.float32)

    out = jax.block_until_ready(multicoil_forward(image, mask, smaps))
    ref = _reference(image, mask, smaps)
    assert out.shape == (B, C, H, W) and out.dtype == jnp.complex64
    np.testing.assert_allclose(np.asarray(out), np.asarray(ref), rtol=1e-4, atol=2e-4)

    # Case 2: 128x128 exercises the square / already-lane-aligned path and a shared (batch-1) mask.
    B, C, H, W = 1, 3, 128, 128
    k1, k2, k3, k4, k5 = jax.random.split(jax.random.PRNGKey(1), 5)
    image = (jax.random.normal(k1, (B, 1, H, W))
             + 1j * jax.random.normal(k2, (B, 1, H, W))).astype(jnp.complex64)
    smaps = (jax.random.normal(k3, (B, C, H, W))
             + 1j * jax.random.normal(k4, (B, C, H, W))).astype(jnp.complex64)
    mask = (jax.random.uniform(k5, (1, 1, H, W)) > 0.4).astype(jnp.float32)

    out = jax.block_until_ready(multicoil_forward(image, mask, smaps))
    ref = _reference(image, mask, smaps)
    assert out.shape == (B, C, H, W) and out.dtype == jnp.complex64
    np.testing.assert_allclose(np.asarray(out), np.asarray(ref), rtol=2e-3, atol=2e-3)

    print("KERNEL_OK")
</pallas_src>

<mosaic_0001>
module attributes {stable_mosaic.version = 11 : i64} {
  func.func @_mfwd_kernel(%arg0: i32, %arg1: i32, %arg2: memref<1x32x16xf32, #tpu.memory_space<vmem>>, %arg3: memref<1x128x16xf32, #tpu.memory_space<vmem>>, %arg4: memref<1x16x128xf32, #tpu.memory_space<vmem>>, %arg5: memref<16x16xf32, #tpu.memory_space<vmem>>, %arg6: memref<16x16xf32, #tpu.memory_space<vmem>>, %arg7: memref<16x16xf32, #tpu.memory_space<vmem>>, %arg8: memref<16x128xf32, #tpu.memory_space<vmem>>, %arg9: memref<16x128xf32, #tpu.memory_space<vmem>>, %arg10: memref<16x128xf32, #tpu.memory_space<vmem>>, %arg11: memref<1x128x128xf32, #tpu.memory_space<vmem>>) attributes {dimension_semantics = [#tpu.dimension_semantics<parallel>, #tpu.dimension_semantics<parallel>], iteration_bounds = array<i64: 2, 1>, scalar_prefetch = 0 : i64, scratch_operands = 0 : i64, tpu.core_type = #tpu.core_type<tc>, window_params = [{transform_indices = @transform_0, window_bounds = array<i64: 1, 32, 16>}, {transform_indices = @transform_1, window_bounds = array<i64: 1, 128, 16>}, {transform_indices = @transform_2, window_bounds = array<i64: 1, 16, 128>}, {pipeline_mode = #tpu.pipeline_mode<synchronous>, transform_indices = @transform_3, window_bounds = array<i64: 16, 16>}, {pipeline_mode = #tpu.pipeline_mode<synchronous>, transform_indices = @transform_4, window_bounds = array<i64: 16, 16>}, {pipeline_mode = #tpu.pipeline_mode<synchronous>, transform_indices = @transform_5, window_bounds = array<i64: 16, 16>}, {pipeline_mode = #tpu.pipeline_mode<synchronous>, transform_indices = @transform_6, window_bounds = array<i64: 16, 128>}, {pipeline_mode = #tpu.pipeline_mode<synchronous>, transform_indices = @transform_7, window_bounds = array<i64: 16, 128>}, {pipeline_mode = #tpu.pipeline_mode<synchronous>, transform_indices = @transform_8, window_bounds = array<i64: 16, 128>}, {transform_indices = @transform_9, window_bounds = array<i64: 1, 128, 128>}]} {
    %c0 = arith.constant 0 : index
    %c0_0 = arith.constant 0 : index
    %c0_1 = arith.constant 0 : index
    %0 = vector.load %arg4[%c0, %c0_0, %c0_1] : memref<1x16x128xf32, #tpu.memory_space<vmem>>, vector<1x16x128xf32>
    %1 = vector.shape_cast %0 : vector<1x16x128xf32> to vector<16x128xf32>
    %c0_i32 = arith.constant 0 : i32
    %c0_i32_2 = arith.constant 0 : i32
    %c0_i32_3 = arith.constant 0 : i32
    %2 = tpu.memref_slice %arg2[%c0_i32, %c0_i32_2, %c0_i32_3] : memref<1x32x16xf32, #tpu.memory_space<vmem>> -> memref<1x32x16xf32, #tpu.memory_space<vmem>>
    %3 = tpu.memref_squeeze %2 : memref<1x32x16xf32, #tpu.memory_space<vmem>> -> memref<32x16xf32, #tpu.memory_space<vmem>>
    %c0_4 = arith.constant 0 : index
    %c0_5 = arith.constant 0 : index
    %4 = vector.load %3[%c0_4, %c0_5] : memref<32x16xf32, #tpu.memory_space<vmem>>, vector<16x16xf32>
    %c0_i32_6 = arith.constant 0 : i32
    %c0_i32_7 = arith.constant 0 : i32
    %c0_i32_8 = arith.constant 0 : i32
    %5 = tpu.memref_slice %arg2[%c0_i32_6, %c0_i32_7, %c0_i32_8] : memref<1x32x16xf32, #tpu.memory_space<vmem>> -> memref<1x32x16xf32, #tpu.memory_space<vmem>>
    %6 = tpu.memref_squeeze %5 : memref<1x32x16xf32, #tpu.memory_space<vmem>> -> memref<32x16xf32, #tpu.memory_space<vmem>>
    %c16 = arith.constant 16 : index
    %c0_9 = arith.constant 0 : index
    %7 = vector.load %6[%c16, %c0_9] : memref<32x16xf32, #tpu.memory_space<vmem>>, vector<16x16xf32>
    %c0_10 = arith.constant 0 : index
    %c0_11 = arith.constant 0 : index
    %8 = vector.load %arg5[%c0_10, %c0_11] : memref<16x16xf32, #tpu.memory_space<vmem>>, vector<16x16xf32>
    %c0_12 = arith.constant 0 : index
    %c0_13 = arith.constant 0 : index
    %9 = vector.load %arg6[%c0_12, %c0_13] : memref<16x16xf32, #tpu.memory_space<vmem>>, vector<16x16xf32>
    %c0_14 = arith.constant 0 : index
    %c0_15 = arith.constant 0 : index
    %10 = vector.load %arg7[%c0_14, %c0_15] : memref<16x16xf32, #tpu.memory_space<vmem>>, vector<16x16xf32>
    %c0_16 = arith.constant 0 : index
    %c0_17 = arith.constant 0 : index
    %11 = vector.load %arg8[%c0_16, %c0_17] : memref<16x128xf32, #tpu.memory_space<vmem>>, vector<16x128xf32>
    %c0_18 = arith.constant 0 : index
    %c0_19 = arith.constant 0 : index
    %12 = vector.load %arg9[%c0_18, %c0_19] : memref<16x128xf32, #tpu.memory_space<vmem>>, vector<16x128xf32>
    %c0_20 = arith.constant 0 : index
    %c0_21 = arith.constant 0 : index
    %13 = vector.load %arg10[%c0_20, %c0_21] : memref<16x128xf32, #tpu.memory_space<vmem>>, vector<16x128xf32>
    %c0_i32_22 = arith.constant 0 : i32
    %c0_i32_23 = arith.constant 0 : i32
    %c0_i32_24 = arith.constant 0 : i32
    %c32_i32 = arith.constant 32 : i32
    %14 = arith.muli %c0_i32_24, %c32_i32 : i32
    %15 = tpu.assume_multiple %14, 8 : i32
    %c0_i32_25 = arith.constant 0 : i32
    %c0_i32_26 = arith.constant 0 : i32
    %16 = tpu.memref_slice %arg3[%c0_i32_22, %c0_i32_25, %c0_i32_26] : memref<1x128x16xf32, #tpu.memory_space<vmem>> -> memref<1x128x16xf32, #tpu.memory_space<vmem>>
    %17 = tpu.memref_squeeze %16 : memref<1x128x16xf32, #tpu.memory_space<vmem>> -> memref<128x16xf32, #tpu.memory_space<vmem>>
    %18 = arith.index_cast %15 : i32 to index
    %c0_27 = arith.constant 0 : index
    %19 = vector.load %17[%18, %c0_27] : memref<128x16xf32, #tpu.memory_space<vmem>>, vector<16x16xf32>
    %c16_i32 = arith.constant 16 : i32
    %20 = arith.addi %15, %c16_i32 : i32
    %c0_i32_28 = arith.constant 0 : i32
    %c0_i32_29 = arith.constant 0 : i32
    %21 = tpu.memref_slice %arg3[%c0_i32_22, %c0_i32_28, %c0_i32_29] : memref<1x128x16xf32, #tpu.memory_space<vmem>> -> memref<1x128x16xf32, #tpu.memory_space<vmem>>
    %22 = tpu.memref_squeeze %21 : memref<1x128x16xf32, #tpu.memory_space<vmem>> -> memref<128x16xf32, #tpu.memory_space<vmem>>
    %23 = arith.index_cast %20 : i32 to index
    %c0_30 = arith.constant 0 : index
    %24 = vector.load %22[%23, %c0_30] : memref<128x16xf32, #tpu.memory_space<vmem>>, vector<16x16xf32>
    %25 = arith.mulf %4, %19 : vector<16x16xf32>
    %26 = arith.mulf %7, %24 : vector<16x16xf32>
    %27 = arith.subf %25, %26 : vector<16x16xf32>
    %28 = arith.mulf %4, %24 : vector<16x16xf32>
    %29 = arith.mulf %7, %19 : vector<16x16xf32>
    %30 = arith.addf %28, %29 : vector<16x16xf32>
    %31 = arith.addf %27, %30 : vector<16x16xf32>
    %cst = arith.constant dense<0.000000e+00> : vector<16x128xf32>
    %32 = tpu.matmul %27, %11, %cst {dimension_numbers = #tpu.dot_dimension_numbers<[1], [0], [0], [1], [0, 0, 1, 1], [], []>} : vector<16x16xf32>, vector<16x128xf32>, vector<16x128xf32> -> vector<16x128xf32>
    %cst_31 = arith.constant dense<0.000000e+00> : vector<16x128xf32>
    %33 = tpu.matmul %30, %12, %cst_31 {dimension_numbers = #tpu.dot_dimension_numbers<[1], [0], [0], [1], [0, 0, 1, 1], [], []>} : vector<16x16xf32>, vector<16x128xf32>, vector<16x128xf32> -> vector<16x128xf32>
    %cst_32 = arith.constant dense<0.000000e+00> : vector<16x128xf32>
    %34 = tpu.matmul %31, %13, %cst_32 {dimension_numbers = #tpu.dot_dimension_numbers<[1], [0], [0], [1], [0, 0, 1, 1], [], []>} : vector<16x16xf32>, vector<16x128xf32>, vector<16x128xf32> -> vector<16x128xf32>
    %35 = arith.subf %32, %33 : vector<16x128xf32>
    %36 = arith.subf %34, %32 : vector<16x128xf32>
    %37 = arith.subf %36, %33 : vector<16x128xf32>
    %38 = arith.addf %35, %37 : vector<16x128xf32>
    %cst_33 = arith.constant dense<0.000000e+00> : vector<16x128xf32>
    %39 = tpu.matmul %8, %35, %cst_33 {dimension_numbers = #tpu.dot_dimension_numbers<[1], [0], [0], [1], [0, 0, 1, 1], [], []>} : vector<16x16xf32>, vector<16x128xf32>, vector<16x128xf32> -> vector<16x128xf32>
    %cst_34 = arith.constant dense<0.000000e+00> : vector<16x128xf32>
    %40 = tpu.matmul %9, %37, %cst_34 {dimension_numbers = #tpu.dot_dimension_numbers<[1], [0], [0], [1], [0, 0, 1, 1], [], []>} : vector<16x16xf32>, vector<16x128xf32>, vector<16x128xf32> -> vector<16x128xf32>
    %cst_35 = arith.constant dense<0.000000e+00> : vector<16x128xf32>
    %41 = tpu.matmul %10, %38, %cst_35 {dimension_numbers = #tpu.dot_dimension_numbers<[1], [0], [0], [1], [0, 0, 1, 1], [], []>} : vector<16x16xf32>, vector<16x128xf32>, vector<16x128xf32> -> vector<16x128xf32>
    %42 = arith.subf %39, %40 : vector<16x128xf32>
    %43 = arith.subf %41, %39 : vector<16x128xf32>
    %44 = arith.subf %43, %40 : vector<16x128xf32>
    %45 = arith.mulf %42, %1 : vector<16x128xf32>
    %c0_i32_36 = arith.constant 0 : i32
    %c0_i32_37 = arith.constant 0 : i32
    %46 = tpu.memref_slice %arg11[%c0_i32_23, %c0_i32_36, %c0_i32_37] : memref<1x128x128xf32, #tpu.memory_space<vmem>> -> memref<1x128x128xf32, #tpu.memory_space<vmem>>
    %47 = tpu.memref_squeeze %46 : memref<1x128x128xf32, #tpu.memory_space<vmem>> -> memref<128x128xf32, #tpu.memory_space<vmem>>
    %48 = arith.index_cast %15 : i32 to index
    %c0_38 = arith.constant 0 : index
    %49 = vector.load %47[%48, %c0_38] : memref<128x128xf32, #tpu.memory_space<vmem>>, vector<16x128xf32>
    tpu.vector_store %47[%48, %c0_38], %45 {strides = array<i32>} : memref<128x128xf32, #tpu.memory_space<vmem>>, vector<16x128xf32>,
    %50 = arith.mulf %44, %1 : vector<16x128xf32>
    %c16_i32_39 = arith.constant 16 : i32
    %51 = arith.addi %15, %c16_i32_39 : i32
    %c0_i32_40 = arith.constant 0 : i32
    %c0_i32_41 = arith.constant 0 : i32
    %52 = tpu.memref_slice %arg11[%c0_i32_23, %c0_i32_40, %c0_i32_41] : memref<1x128x128xf32, #tpu.memory_space<vmem>> -> memref<1x128x128xf32, #tpu.memory_space<vmem>>
    %53 = tpu.memref_squeeze %52 : memref<1x128x128xf32, #tpu.memory_space<vmem>> -> memref<128x128xf32, #tpu.memory_space<vmem>>
    %54 = arith.index_cast %51 : i32 to index
    %c0_42 = arith.constant 0 : index
    %55 = vector.load %53[%54, %c0_42] : memref<128x128xf32, #tpu.memory_space<vmem>>, vector<16x128xf32>
    tpu.vector_store %53[%54, %c0_42], %50 {strides = array<i32>} : memref<128x128xf32, #tpu.memory_space<vmem>>, vector<16x128xf32>,
    %c1_i32 = arith.constant 1 : i32
    %c32_i32_43 = arith.constant 32 : i32
    %56 = arith.muli %c1_i32, %c32_i32_43 : i32
    %57 = tpu.assume_multiple %56, 8 : i32
    %c0_i32_44 = arith.constant 0 : i32
    %c0_i32_45 = arith.constant 0 : i32
    %58 = tpu.memref_slice %arg3[%c0_i32_22, %c0_i32_44, %c0_i32_45] : memref<1x128x16xf32, #tpu.memory_space<vmem>> -> memref<1x128x16xf32, #tpu.memory_space<vmem>>
    %59 = tpu.memref_squeeze %58 : memref<1x128x16xf32, #tpu.memory_space<vmem>> -> memref<128x16xf32, #tpu.memory_space<vmem>>
    %60 = arith.index_cast %57 : i32 to index
    %c0_46 = arith.constant 0 : index
    %61 = vector.load %59[%60, %c0_46] : memref<128x16xf32, #tpu.memory_space<vmem>>, vector<16x16xf32>
    %c16_i32_47 = arith.constant 16 : i32
    %62 = arith.addi %57, %c16_i32_47 : i32
    %c0_i32_48 = arith.constant 0 : i32
    %c0_i32_49 = arith.constant 0 : i32
    %63 = tpu.memref_slice %arg3[%c0_i32_22, %c0_i32_48, %c0_i32_49] : memref<1x128x16xf32, #tpu.memory_space<vmem>> -> memref<1x128x16xf32, #tpu.memory_space<vmem>>
    %64 = tpu.memref_squeeze %63 : memref<1x128x16xf32, #tpu.memory_space<vmem>> -> memref<128x16xf32, #tpu.memory_space<vmem>>
    %65 = arith.index_cast %62 : i32 to index
    %c0_50 = arith.constant 0 : index
    %66 = vector.load %64[%65, %c0_50] : memref<128x16xf32, #tpu.memory_space<vmem>>, vector<16x16xf32>
    %67 = arith.mulf %4, %61 : vector<16x16xf32>
    %68 = arith.mulf %7, %66 : vector<16x16xf32>
    %69 = arith.subf %67, %68 : vector<16x16xf32>
    %70 = arith.mulf %4, %66 : vector<16x16xf32>
    %71 = arith.mulf %7, %61 : vector<16x16xf32>
    %72 = arith.addf %70, %71 : vector<16x16xf32>
    %73 = arith.addf %69, %72 : vector<16x16xf32>
    %cst_51 = arith.constant dense<0.000000e+00> : vector<16x128xf32>
    %74 = tpu.matmul %69, %11, %cst_51 {dimension_numbers = #tpu.dot_dimension_numbers<[1], [0], [0], [1], [0, 0, 1, 1], [], []>} : vector<16x16xf32>, vector<16x128xf32>, vector<16x128xf32> -> vector<16x128xf32>
    %cst_52 = arith.constant dense<0.000000e+00> : vector<16x128xf32>
    %75 = tpu.matmul %72, %12, %cst_52 {dimension_numbers = #tpu.dot_dimension_numbers<[1], [0], [0], [1], [0, 0, 1, 1], [], []>} : vector<16x16xf32>, vector<16x128xf32>, vector<16x128xf32> -> vector<16x128xf32>
    %cst_53 = arith.constant dense<0.000000e+00> : vector<16x128xf32>
    %76 = tpu.matmul %73, %13, %cst_53 {dimension_numbers = #tpu.dot_dimension_numbers<[1], [0], [0], [1], [0, 0, 1, 1], [], []>} : vector<16x16xf32>, vector<16x128xf32>, vector<16x128xf32> -> vector<16x128xf32>
    %77 = arith.subf %74, %75 : vector<16x128xf32>
    %78 = arith.subf %76, %74 : vector<16x128xf32>
    %79 = arith.subf %78, %75 : vector<16x128xf32>
    %80 = arith.addf %77, %79 : vector<16x128xf32>
    %cst_54 = arith.constant dense<0.000000e+00> : vector<16x128xf32>
    %81 = tpu.matmul %8, %77, %cst_54 {dimension_numbers = #tpu.dot_dimension_numbers<[1], [0], [0], [1], [0, 0, 1, 1], [], []>} : vector<16x16xf32>, vector<16x128xf32>, vector<16x128xf32> -> vector<16x128xf32>
    %cst_55 = arith.constant dense<0.000000e+00> : vector<16x128xf32>
    %82 = tpu.matmul %9, %79, %cst_55 {dimension_numbers = #tpu.dot_dimension_numbers<[1], [0], [0], [1], [0, 0, 1, 1], [], []>} : vector<16x16xf32>, vector<16x128xf32>, vector<16x128xf32> -> vector<16x128xf32>
    %cst_56 = arith.constant dense<0.000000e+00> : vector<16x128xf32>
    %83 = tpu.matmul %10, %80, %cst_56 {dimension_numbers = #tpu.dot_dimension_numbers<[1], [0], [0], [1], [0, 0, 1, 1], [], []>} : vector<16x16xf32>, vector<16x128xf32>, vector<16x128xf32> -> vector<16x128xf32>
    %84 = arith.subf %81, %82 : vector<16x128xf32>
    %85 = arith.subf %83, %81 : vector<16x128xf32>
    %86 = arith.subf %85, %82 : vector<16x128xf32>
    %87 = arith.mulf %84, %1 : vector<16x128xf32>
    %c0_i32_57 = arith.constant 0 : i32
    %c0_i32_58 = arith.constant 0 : i32
    %88 = tpu.memref_slice %arg11[%c0_i32_23, %c0_i32_57, %c0_i32_58] : memref<1x128x128xf32, #tpu.memory_space<vmem>> -> memref<1x128x128xf32, #tpu.memory_space<vmem>>
    %89 = tpu.memref_squeeze %88 : memref<1x128x128xf32, #tpu.memory_space<vmem>> -> memref<128x128xf32, #tpu.memory_space<vmem>>
    %90 = arith.index_cast %57 : i32 to index
    %c0_59 = arith.constant 0 : index
    %91 = vector.load %89[%90, %c0_59] : memref<128x128xf32, #tpu.memory_space<vmem>>, vector<16x128xf32>
    tpu.vector_store %89[%90, %c0_59], %87 {strides = array<i32>} : memref<128x128xf32, #tpu.memory_space<vmem>>, vector<16x128xf32>,
    %92 = arith.mulf %86, %1 : vector<16x128xf32>
    %c16_i32_60 = arith.constant 16 : i32
    %93 = arith.addi %57, %c16_i32_60 : i32
    %c0_i32_61 = arith.constant 0 : i32
    %c0_i32_62 = arith.constant 0 : i32
    %94 = tpu.memref_slice %arg11[%c0_i32_23, %c0_i32_61, %c0_i32_62] : memref<1x128x128xf32, #tpu.memory_space<vmem>> -> memref<1x128x128xf32, #tpu.memory_space<vmem>>
    %95 = tpu.memref_squeeze %94 : memref<1x128x128xf32, #tpu.memory_space<vmem>> -> memref<128x128xf32, #tpu.memory_space<vmem>>
    %96 = arith.index_cast %93 : i32 to index
    %c0_63 = arith.constant 0 : index
    %97 = vector.load %95[%96, %c0_63] : memref<128x128xf32, #tpu.memory_space<vmem>>, vector<16x128xf32>
    tpu.vector_store %95[%96, %c0_63], %92 {strides = array<i32>} : memref<128x128xf32, #tpu.memory_space<vmem>>, vector<16x128xf32>,
    %c2_i32 = arith.constant 2 : i32
    %c32_i32_64 = arith.constant 32 : i32
    %98 = arith.muli %c2_i32, %c32_i32_64 : i32
    %99 = tpu.assume_multiple %98, 8 : i32
    %c0_i32_65 = arith.constant 0 : i32
    %c0_i32_66 = arith.constant 0 : i32
    %100 = tpu.memref_slice %arg3[%c0_i32_22, %c0_i32_65, %c0_i32_66] : memref<1x128x16xf32, #tpu.memory_space<vmem>> -> memref<1x128x16xf32, #tpu.memory_space<vmem>>
    %101 = tpu.memref_squeeze %100 : memref<1x128x16xf32, #tpu.memory_space<vmem>> -> memref<128x16xf32, #tpu.memory_space<vmem>>
    %102 = arith.index_cast %99 : i32 to index
    %c0_67 = arith.constant 0 : index
    %103 = vector.load %101[%102, %c0_67] : memref<128x16xf32, #tpu.memory_space<vmem>>, vector<16x16xf32>
    %c16_i32_68 = arith.constant 16 : i32
    %104 = arith.addi %99, %c16_i32_68 : i32
    %c0_i32_69 = arith.constant 0 : i32
    %c0_i32_70 = arith.constant 0 : i32
    %105 = tpu.memref_slice %arg3[%c0_i32_22, %c0_i32_69, %c0_i32_70] : memref<1x128x16xf32, #tpu.memory_space<vmem>> -> memref<1x128x16xf32, #tpu.memory_space<vmem>>
    %106 = tpu.memref_squeeze %105 : memref<1x128x16xf32, #tpu.memory_space<vmem>> -> memref<128x16xf32, #tpu.memory_space<vmem>>
    %107 = arith.index_cast %104 : i32 to index
    %c0_71 = arith.constant 0 : index
    %108 = vector.load %106[%107, %c0_71] : memref<128x16xf32, #tpu.memory_space<vmem>>, vector<16x16xf32>
    %109 = arith.mulf %4, %103 : vector<16x16xf32>
    %110 = arith.mulf %7, %108 : vector<16x16xf32>
    %111 = arith.subf %109, %110 : vector<16x16xf32>
    %112 = arith.mulf %4, %108 : vector<16x16xf32>
    %113 = arith.mulf %7, %103 : vector<16x16xf32>
    %114 = arith.addf %112, %113 : vector<16x16xf32>
    %115 = arith.addf %111, %114 : vector<16x16xf32>
    %cst_72 = arith.constant dense<0.000000e+00> : vector<16x128xf32>
    %116 = tpu.matmul %111, %11, %cst_72 {dimension_numbers = #tpu.dot_dimension_numbers<[1], [0], [0], [1], [0, 0, 1, 1], [], []>} : vector<16x16xf32>, vector<16x128xf32>, vector<16x128xf32> -> vector<16x128xf32>
    %cst_73 = arith.constant dense<0.000000e+00> : vector<16x128xf32>
    %117 = tpu.matmul %114, %12, %cst_73 {dimension_numbers = #tpu.dot_dimension_numbers<[1], [0], [0], [1], [0, 0, 1, 1], [], []>} : vector<16x16xf32>, vector<16x128xf32>, vector<16x128xf32> -> vector<16x128xf32>
    %cst_74 = arith.constant dense<0.000000e+00> : vector<16x128xf32>
    %118 = tpu.matmul %115, %13, %cst_74 {dimension_numbers = #tpu.dot_dimension_numbers<[1], [0], [0], [1], [0, 0, 1, 1], [], []>} : vector<16x16xf32>, vector<16x128xf32>, vector<16x128xf32> -> vector<16x128xf32>
    %119 = arith.subf %116, %117 : vector<16x128xf32>
    %120 = arith.subf %118, %116 : vector<16x128xf32>
    %121 = arith.subf %120, %117 : vector<16x128xf32>
    %122 = arith.addf %119, %121 : vector<16x128xf32>
    %cst_75 = arith.constant dense<0.000000e+00> : vector<16x128xf32>
    %123 = tpu.matmul %8, %119, %cst_75 {dimension_numbers = #tpu.dot_dimension_numbers<[1], [0], [0], [1], [0, 0, 1, 1], [], []>} : vector<16x16xf32>, vector<16x128xf32>, vector<16x128xf32> -> vector<16x128xf32>
    %cst_76 = arith.constant dense<0.000000e+00> : vector<16x128xf32>
    %124 = tpu.matmul %9, %121, %cst_76 {dimension_numbers = #tpu.dot_dimension_numbers<[1], [0], [0], [1], [0, 0, 1, 1], [], []>} : vector<16x16xf32>, vector<16x128xf32>, vector<16x128xf32> -> vector<16x128xf32>
    %cst_77 = arith.constant dense<0.000000e+00> : vector<16x128xf32>
    %125 = tpu.matmul %10, %122, %cst_77 {dimension_numbers = #tpu.dot_dimension_numbers<[1], [0], [0], [1], [0, 0, 1, 1], [], []>} : vector<16x16xf32>, vector<16x128xf32>, vector<16x128xf32> -> vector<16x128xf32>
    %126 = arith.subf %123, %124 : vector<16x128xf32>
    %127 = arith.subf %125, %123 : vector<16x128xf32>
    %128 = arith.subf %127, %124 : vector<16x128xf32>
    %129 = arith.mulf %126, %1 : vector<16x128xf32>
    %c0_i32_78 = arith.constant 0 : i32
    %c0_i32_79 = arith.constant 0 : i32
    %130 = tpu.memref_slice %arg11[%c0_i32_23, %c0_i32_78, %c0_i32_79] : memref<1x128x128xf32, #tpu.memory_space<vmem>> -> memref<1x128x128xf32, #tpu.memory_space<vmem>>
    %131 = tpu.memref_squeeze %130 : memref<1x128x128xf32, #tpu.memory_space<vmem>> -> memref<128x128xf32, #tpu.memory_space<vmem>>
    %132 = arith.index_cast %99 : i32 to index
    %c0_80 = arith.constant 0 : index
    %133 = vector.load %131[%132, %c0_80] : memref<128x128xf32, #tpu.memory_space<vmem>>, vector<16x128xf32>
    tpu.vector_store %131[%132, %c0_80], %129 {strides = array<i32>} : memref<128x128xf32, #tpu.memory_space<vmem>>, vector<16x128xf32>,
    %134 = arith.mulf %128, %1 : vector<16x128xf32>
    %c16_i32_81 = arith.constant 16 : i32
    %135 = arith.addi %99, %c16_i32_81 : i32
    %c0_i32_82 = arith.constant 0 : i32
    %c0_i32_83 = arith.constant 0 : i32
    %136 = tpu.memref_slice %arg11[%c0_i32_23, %c0_i32_82, %c0_i32_83] : memref<1x128x128xf32, #tpu.memory_space<vmem>> -> memref<1x128x128xf32, #tpu.memory_space<vmem>>
    %137 = tpu.memref_squeeze %136 : memref<1x128x128xf32, #tpu.memory_space<vmem>> -> memref<128x128xf32, #tpu.memory_space<vmem>>
    %138 = arith.index_cast %135 : i32 to index
    %c0_84 = arith.constant 0 : index
    %139 = vector.load %137[%138, %c0_84] : memref<128x128xf32, #tpu.memory_space<vmem>>, vector<16x128xf32>
    tpu.vector_store %137[%138, %c0_84], %134 {strides = array<i32>} : memref<128x128xf32, #tpu.memory_space<vmem>>, vector<16x128xf32>,
    %c3_i32 = arith.constant 3 : i32
    %c32_i32_85 = arith.constant 32 : i32
    %140 = arith.muli %c3_i32, %c32_i32_85 : i32
    %141 = tpu.assume_multiple %140, 8 : i32
    %c0_i32_86 = arith.constant 0 : i32
    %c0_i32_87 = arith.constant 0 : i32
    %142 = tpu.memref_slice %arg3[%c0_i32_22, %c0_i32_86, %c0_i32_87] : memref<1x128x16xf32, #tpu.memory_space<vmem>> -> memref<1x128x16xf32, #tpu.memory_space<vmem>>
    %143 = tpu.memref_squeeze %142 : memref<1x128x16xf32, #tpu.memory_space<vmem>> -> memref<128x16xf32, #tpu.memory_space<vmem>>
    %144 = arith.index_cast %141 : i32 to index
    %c0_88 = arith.constant 0 : index
    %145 = vector.load %143[%144, %c0_88] : memref<128x16xf32, #tpu.memory_space<vmem>>, vector<16x16xf32>
    %c16_i32_89 = arith.constant 16 : i32
    %146 = arith.addi %141, %c16_i32_89 : i32
    %c0_i32_90 = arith.constant 0 : i32
    %c0_i32_91 = arith.constant 0 : i32
    %147 = tpu.memref_slice %arg3[%c0_i32_22, %c0_i32_90, %c0_i32_91] : memref<1x128x16xf32, #tpu.memory_space<vmem>> -> memref<1x128x16xf32, #tpu.memory_space<vmem>>
    %148 = tpu.memref_squeeze %147 : memref<1x128x16xf32, #tpu.memory_space<vmem>> -> memref<128x16xf32, #tpu.memory_space<vmem>>
    %149 = arith.index_cast %146 : i32 to index
    %c0_92 = arith.constant 0 : index
    %150 = vector.load %148[%149, %c0_92] : memref<128x16xf32, #tpu.memory_space<vmem>>, vector<16x16xf32>
    %151 = arith.mulf %4, %145 : vector<16x16xf32>
    %152 = arith.mulf %7, %150 : vector<16x16xf32>
    %153 = arith.subf %151, %152 : vector<16x16xf32>
    %154 = arith.mulf %4, %150 : vector<16x16xf32>
    %155 = arith.mulf %7, %145 : vector<16x16xf32>
    %156 = arith.addf %154, %155 : vector<16x16xf32>
    %157 = arith.addf %153, %156 : vector<16x16xf32>
    %cst_93 = arith.constant dense<0.000000e+00> : vector<16x128xf32>
    %158 = tpu.matmul %153, %11, %cst_93 {dimension_numbers = #tpu.dot_dimension_numbers<[1], [0], [0], [1], [0, 0, 1, 1], [], []>} : vector<16x16xf32>, vector<16x128xf32>, vector<16x128xf32> -> vector<16x128xf32>
    %cst_94 = arith.constant dense<0.000000e+00> : vector<16x128xf32>
    %159 = tpu.matmul %156, %12, %cst_94 {dimension_numbers = #tpu.dot_dimension_numbers<[1], [0], [0], [1], [0, 0, 1, 1], [], []>} : vector<16x16xf32>, vector<16x128xf32>, vector<16x128xf32> -> vector<16x128xf32>
    %cst_95 = arith.constant dense<0.000000e+00> : vector<16x128xf32>
    %160 = tpu.matmul %157, %13, %cst_95 {dimension_numbers = #tpu.dot_dimension_numbers<[1], [0], [0], [1], [0, 0, 1, 1], [], []>} : vector<16x16xf32>, vector<16x128xf32>, vector<16x128xf32> -> vector<16x128xf32>
    %161 = arith.subf %158, %159 : vector<16x128xf32>
    %162 = arith.subf %160, %158 : vector<16x128xf32>
    %163 = arith.subf %162, %159 : vector<16x128xf32>
    %164 = arith.addf %161, %163 : vector<16x128xf32>
    %cst_96 = arith.constant dense<0.000000e+00> : vector<16x128xf32>
    %165 = tpu.matmul %8, %161, %cst_96 {dimension_numbers = #tpu.dot_dimension_numbers<[1], [0], [0], [1], [0, 0, 1, 1], [], []>} : vector<16x16xf32>, vector<16x128xf32>, vector<16x128xf32> -> vector<16x128xf32>
    %cst_97 = arith.constant dense<0.000000e+00> : vector<16x128xf32>
    %166 = tpu.matmul %9, %163, %cst_97 {dimension_numbers = #tpu.dot_dimension_numbers<[1], [0], [0], [1], [0, 0, 1, 1], [], []>} : vector<16x16xf32>, vector<16x128xf32>, vector<16x128xf32> -> vector<16x128xf32>
    %cst_98 = arith.constant dense<0.000000e+00> : vector<16x128xf32>
    %167 = tpu.matmul %10, %164, %cst_98 {dimension_numbers = #tpu.dot_dimension_numbers<[1], [0], [0], [1], [0, 0, 1, 1], [], []>} : vector<16x16xf32>, vector<16x128xf32>, vector<16x128xf32> -> vector<16x128xf32>
    %168 = arith.subf %165, %166 : vector<16x128xf32>
    %169 = arith.subf %167, %165 : vector<16x128xf32>
    %170 = arith.subf %169, %166 : vector<16x128xf32>
    %171 = arith.mulf %168, %1 : vector<16x128xf32>
    %c0_i32_99 = arith.constant 0 : i32
    %c0_i32_100 = arith.constant 0 : i32
    %172 = tpu.memref_slice %arg11[%c0_i32_23, %c0_i32_99, %c0_i32_100] : memref<1x128x128xf32, #tpu.memory_space<vmem>> -> memref<1x128x128xf32, #tpu.memory_space<vmem>>
    %173 = tpu.memref_squeeze %172 : memref<1x128x128xf32, #tpu.memory_space<vmem>> -> memref<128x128xf32, #tpu.memory_space<vmem>>
    %174 = arith.index_cast %141 : i32 to index
    %c0_101 = arith.constant 0 : index
    %175 = vector.load %173[%174, %c0_101] : memref<128x128xf32, #tpu.memory_space<vmem>>, vector<16x128xf32>
    tpu.vector_store %173[%174, %c0_101], %171 {strides = array<i32>} : memref<128x128xf32, #tpu.memory_space<vmem>>, vector<16x128xf32>,
    %176 = arith.mulf %170, %1 : vector<16x128xf32>
    %c16_i32_102 = arith.constant 16 : i32
    %177 = arith.addi %141, %c16_i32_102 : i32
    %c0_i32_103 = arith.constant 0 : i32
    %c0_i32_104 = arith.constant 0 : i32
    %178 = tpu.memref_slice %arg11[%c0_i32_23, %c0_i32_103, %c0_i32_104] : memref<1x128x128xf32, #tpu.memory_space<vmem>> -> memref<1x128x128xf32, #tpu.memory_space<vmem>>
    %179 = tpu.memref_squeeze %178 : memref<1x128x128xf32, #tpu.memory_space<vmem>> -> memref<128x128xf32, #tpu.memory_space<vmem>>
    %180 = arith.index_cast %177 : i32 to index
    %c0_105 = arith.constant 0 : index
    %181 = vector.load %179[%180, %c0_105] : memref<128x128xf32, #tpu.memory_space<vmem>>, vector<16x128xf32>
    tpu.vector_store %179[%180, %c0_105], %176 {strides = array<i32>} : memref<128x128xf32, #tpu.memory_space<vmem>>, vector<16x128xf32>,
    %c4_i32 = arith.constant 4 : i32
    return
  }
  func.func @transform_0(%arg0: i32, %arg1: i32) -> (i32, i32, i32) {
    %c0_i32 = arith.constant 0 : i32
    %c0_i32_0 = arith.constant 0 : i32
    %c0_i32_1 = arith.constant 0 : i32
    return %arg0, %c0_i32, %c0_i32_0 : i32, i32, i32
  }
  func.func @transform_1(%arg0: i32, %arg1: i32) -> (i32, i32, i32) {
    %c0_i32 = arith.constant 0 : i32
    %c0_i32_0 = arith.constant 0 : i32
    return %arg0, %arg1, %c0_i32 : i32, i32, i32
  }
  func.func @transform_2(%arg0: i32, %arg1: i32) -> (i32, i32, i32) {
    %c0_i32 = arith.constant 0 : i32
    %c0_i32_0 = arith.constant 0 : i32
    %c0_i32_1 = arith.constant 0 : i32
    return %arg0, %c0_i32, %c0_i32_0 : i32, i32, i32
  }
  func.func @transform_3(%arg0: i32, %arg1: i32) -> (i32, i32) {
    %c0_i32 = arith.constant 0 : i32
    %c0_i32_0 = arith.constant 0 : i32
    %c0_i32_1 = arith.constant 0 : i32
    return %c0_i32, %c0_i32_0 : i32, i32
  }
  func.func @transform_4(%arg0: i32, %arg1: i32) -> (i32, i32) {
    %c0_i32 = arith.constant 0 : i32
    %c0_i32_0 = arith.constant 0 : i32
    %c0_i32_1 = arith.constant 0 : i32
    return %c0_i32, %c0_i32_0 : i32, i32
  }
  func.func @transform_5(%arg0: i32, %arg1: i32) -> (i32, i32) {
    %c0_i32 = arith.constant 0 : i32
    %c0_i32_0 = arith.constant 0 : i32
    %c0_i32_1 = arith.constant 0 : i32
    return %c0_i32, %c0_i32_0 : i32, i32
  }
  func.func @transform_6(%arg0: i32, %arg1: i32) -> (i32, i32) {
    %c0_i32 = arith.constant 0 : i32
    %c0_i32_0 = arith.constant 0 : i32
    %c0_i32_1 = arith.constant 0 : i32
    return %c0_i32, %c0_i32_0 : i32, i32
  }
  func.func @transform_7(%arg0: i32, %arg1: i32) -> (i32, i32) {
    %c0_i32 = arith.constant 0 : i32
    %c0_i32_0 = arith.constant 0 : i32
    %c0_i32_1 = arith.constant 0 : i32
    return %c0_i32, %c0_i32_0 : i32, i32
  }
  func.func @transform_8(%arg0: i32, %arg1: i32) -> (i32, i32) {
    %c0_i32 = arith.constant 0 : i32
    %c0_i32_0 = arith.constant 0 : i32
    %c0_i32_1 = arith.constant 0 : i32
    return %c0_i32, %c0_i32_0 : i32, i32
  }
  func.func @transform_9(%arg0: i32, %arg1: i32) -> (i32, i32, i32) {
    %c0_i32 = arith.constant 0 : i32
    %c0_i32_0 = arith.constant 0 : i32
    return %arg0, %arg1, %c0_i32 : i32, i32, i32
  }
}

</mosaic_0001>

<bundles_post_ra>
// kernel: tpu_custom_call.1
= control target key start
LH: loop header
LB: loop body
LE: loop exit
PB: predicated region body
PF: predicated region fallthrough
CT: control target
= control target key end

     0   :  { %14 = vsyncpa [#allocation3], 0  ;;  %s3640_s0 = inlined_call_operand.vmem [shape: f32[2,32,16], index: 0, kind: input, shape index: {}]   ;;  %s3641_s1 = inlined_call_operand.vmem [shape: f32[2,128,16], index: 1, kind: input, shape index: {}]   ;;  %s3642_s2 = inlined_call_operand.vmem [shape: f32[2,16,128], index: 2, kind: input, shape index: {}]   ;;  %s3643_s3 = inlined_call_operand.vmem [shape: f32[16,16], index: 3, kind: input, shape index: {}]   ;;  %s3644_s4 = inlined_call_operand.vmem [shape: f32[16,16], index: 4, kind: input, shape index: {}]   ;;  %s3645_s5 = inlined_call_operand.vmem [shape: f32[16,16], index: 5, kind: input, shape index: {}]   ;;  %s3646_s6 = inlined_call_operand.vmem [shape: f32[16,128], index: 6, kind: input, shape index: {}]   ;;  %s3647_s7 = inlined_call_operand.vmem [shape: f32[16,128], index: 7, kind: input, shape index: {}]   ;;  %s3648_s8 = inlined_call_operand.vmem [shape: f32[16,128], index: 8, kind: input, shape index: {}]   ;;  %s3649_s9 = inlined_call_operand.hbm [shape: f32[2,128,128], index: 9, kind: output, shape index: {}]  }
   0x1   :  { %16 = vsyncpa [#allocation3 + $0x1], 0  ;;  %s3263_s30 = smov 0   ;;  %s3265_s10 = smov 0  }
   0x2   :  { %s3267_s11 = smov 0   ;;  %s3269_s12 = smov 0  }
   0x3   :  { %s3271_s13 = smov 0   ;;  %s3273_s14 = smov 0  }
   0x4 LB: > { %s2616_s15 = sadd.s32 4294967295, %s3208_s14   ;;  %s2617_s16 = sadd.s32 4294967294, %s3208_s14   ;;  %s3208_s14 = sphi %s3273_s14, %s22_s14   ;;  %s3204_s13 = sphi %s3271_s13, %s3656_s13   ;;  %s3200_s12 = sphi %s3269_s12, %s3655_s12   ;;  %s3196_s11 = sphi %s3267_s11, %s3654_s11   ;;  %s3192_s10 = sphi %s3265_s10, %s3653_s10   ;;  %s3188_s30 = sphi %s3263_s30, %s3652_s30  }
   0x5   : > { %s34_s17 = sadd.s32 1, %s3204_s13  ;;  %s249_s18 = sadd.s32 1, %s3196_s11 }
   0x6   : > { %p36_p0 = scmp.ge.s32.totalorder %s34_s17, 2  ;;  %p259_p1 = scmp.ne.s32.totalorder %s3196_s11, %s3192_s10 }
   0x7   : > { %p260_p2 = scmp.eq.s32.totalorder %s2616_s15, 1  ;;  %p265_p3 = scmp.ne.s32.totalorder %s3192_s10, %s3188_s30 }
   0x8   : > { %s3658_s17 = smov (%p36_p0, %s34_s17), 0  ;;  %p266_p5 = scmp.eq.s32.totalorder %s2617_s16, 1 }
   0x9   : > { %p3303_p4 = por %p260_p2, %p259_p1  ;;  %s244_s20 = ssub.s32 %s3204_s13, %s3658_s17 }
   0xa   : > { %p2620_p6 = scmp.ge.s32.totalorder %s3208_s14, 1  ;;  %p247_p7 = scmp.eq.s32.totalorder %s244_s20, 0 }
   0xb   : > { %p3310_p8 = por %p266_p5, %p265_p3  ;;  %p331_p9 = scmp.lt.s32.totalorder %s3208_s14, 3 }
   0xc   : > { %s3316_s22 = scalar_select %p247_p7, %s3196_s11, %s249_s18  }
   0xd   : > { %p332_p10 = pnand %p2620_p6, %p331_p9 }
   0xe   : > { %v414_v0 = vld [vmem:[%s3646_s6] sm:$0xff] (!%p332_p10)  ;;  %v415_v1 = vld [vmem:[%s3646_s6 + $0x8] sm:$0xff] (!%p332_p10)  ;;  %p381_p11 = scmp.lt.s32.totalorder (!%p332_p10), %s3200_s12, 1  ;;  %vm440_vm0 = vcmask (!%p332_p10), 130048   ;;  %s378_s27 = sand.u32 (!%p332_p10), 1, %s3192_s10  }
   0xf   : > { %335 = sbr.rel (%p332_p10) target bundleno = 1189 (0x4a5), region = 56  ;;  %v416_v2 = vld [vmem:[%s3647_s7] sm:$0xff] (!%p332_p10)  ;;  %v3328_v3 = vpack.c.bf16 (!%p332_p10), %v415_v1, %v414_v0  ;;  %v417_v4 = vld [vmem:[%s3647_s7 + $0x8] sm:$0xff] (!%p332_p10)  ;;  %s2621_s16 = sshll.u32 (!%p332_p10), %s378_s27, 7 }
  0x10   : > { %v418_v5 = vld [vmem:[%s3648_s8] sm:$0xff] (!%p332_p10)  ;;  %v419_v6 = vld [vmem:[%s3648_s8 + $0x8] sm:$0xff] (!%p332_p10)  ;;  %v3339_v7 = vpack.c.bf16 (!%p332_p10), %v417_v4, %v416_v2 }
  0x11   : > { %v3344_v8 = vpack.c.bf16 (!%p332_p10), %v419_v6, %v418_v5  ;;  %2978 = vmatprep.subr.bf16.mxu0 (!%p332_p10), %v3328_v3  ;;  %v3391_v31 = vld [vmem:[%s3643_s3] sm:$0xff] (!%p332_p10)  ;;  %v3407_v47 = vld [vmem:[%s3643_s3 + $0x8] sm:$0xff] (!%p332_p10) }
  0x12   : > { %2982 = vmatprep.subr.bf16.mxu1 (!%p332_p10), %v3339_v7  ;;  %2980 = vmatpush3.bf16.msra.mxu0 (!%p332_p10), %v3328_v3  ;;  %v3398_v32 = vld [vmem:[%s3644_s4] sm:$0xff] (!%p332_p10)  ;;  %v3431_v0 = vld [vmem:[%s3644_s4 + $0x8] sm:$0xff] (!%p332_p10) }
  0x13   : > { %2984 = vmatpush3.bf16.msra.mxu1 (!%p332_p10), %v3339_v7  ;;  %2986 = vmatprep.subr.bf16.mxu0 (!%p332_p10), %v3344_v8  ;;  %v3412_v49 = vld [vmem:[%s3645_s5] sm:$0xff] (!%p332_p10)  ;;  %v3437_v4 = vld [vmem:[%s3645_s5 + $0x8] sm:$0xff] (!%p332_p10) }
  0x16   : > { %s3342_s24 = scalar_select %p381_p11, %s3200_s12, 1 }
  0x18   : > { %s2709_s25 = sshll.u32 %s3342_s24, 5  ;;  %s2710_s26 = sshll.u32 %s3342_s24, 7 }
  0x19   : > { %s385_s29 = scalar_lea.vmem %s3640_s0, %s2709_s25  ;;  %s3358_s18 = scalar_lea.vmem %s3641_s1, %s2710_s26 }
  0x1a   : > { %v3361_v9 = vld [vmem:[%s385_s29] sm:$0xff]  ;;  %v3363_v10 = vld [vmem:[%s385_s29 + $0x10] sm:$0xff]  ;;  %v3369_v15 = vld [vmem:[%s385_s29 + $0x8] sm:$0xff]  ;;  %s2711_s26 = sshll.u32 %s3342_s24, 4  ;;  %s3471_s24 = scalar_lea.vmem [#allocation2], %s2621_s16 }
  0x1b   : > { %v420_v11 = vld [vmem:[%s3358_s18] sm:$0xff]  ;;  %v2628_v12 = vld [vmem:[%s3358_s18 + $0x10] sm:$0xff]  ;;  %v3371_v16 = vld [vmem:[%s385_s29 + $0x18] sm:$0xff]  ;;  %s400_s15 = scalar_lea.vmem %s3642_s2, %s2711_s26  ;;  %s2505_s20 = sshll.u32 %s3471_s24, 4  ;;  %s3587_s20 = int_to_ptr.vmem [resolvable:$true] %s2505_s20 }
  0x1c   : > { %v426_v13 = vmul.f32 %v420_v11, %v3361_v9  ;;  %v434_v14 = vmul.f32 %v420_v11, %v3363_v10  ;;  %v428_v17 = vmul.f32 %v2628_v12, %v3363_v10  ;;  %v432_v18 = vmul.f32 %v2628_v12, %v3361_v9  ;;  %v421_v19 = vld [vmem:[%s3358_s18 + $0x8] sm:$0xff]  ;;  %v2629_v20 = vld [vmem:[%s3358_s18 + $0x18] sm:$0xff]  ;;  %v2644_v43 = vld [vmem:[%s3358_s18 + $0x20] sm:$0xff]  ;;  %s3130_s28 = scalar_lea.vmem %s3587_s20, 2048  ;;  %s3210_s29 = smov [#allocation2]  }
  0x1d   : > { %v427_v21 = vmul.f32 %v421_v19, %v3369_v15  ;;  %v429_v22 = vmul.f32 %v2629_v20, %v3371_v16  ;;  %v433_v23 = vmul.f32 %v2629_v20, %v3369_v15  ;;  %v435_v24 = vmul.f32 %v421_v19, %v3371_v16  ;;  %v2646_v45 = vld [vmem:[%s3358_s18 + $0x30] sm:$0xff]  ;;  %v2645_v51 = vld [vmem:[%s3358_s18 + $0x28] sm:$0xff]  ;;  %v2647_v54 = vld [vmem:[%s3358_s18 + $0x38] sm:$0xff]  ;;  %p3131_p12 = scmp.ne.s32.totalorder %s3587_s20, %s3130_s28 }
  0x1e   : > { %v430_v25 = vsub.f32 %v426_v13, %v428_v17  ;;  %v436_v26 = vadd.f32 %v434_v14, %v432_v18  ;;  %v957_v50 = vmul.f32 %v2644_v43, %v3361_v9  ;;  %v959_v53 = vmul.f32 %v2646_v45, %v3363_v10  ;;  %v3465_v17 = vld [vmem:[%s400_s15 + $0x8] sm:$0xff]  ;;  %v3467_v20 = vld [vmem:[%s400_s15] sm:$0xff]  ;;  %s3134_s15 = sshll.u32 %s3210_s29, 4  ;;  %s3135_s15 = int_to_ptr.vmem [resolvable:$false] %s3134_s15 }
  0x1f   : > { %v431_v27 = vsub.f32 %v427_v21, %v429_v22  ;;  %v437_v28 = vadd.f32 %v435_v24, %v433_v23  ;;  %v963_v55 = vmul.f32 %v2646_v45, %v3361_v9  ;;  %v965_v56 = vmul.f32 %v2644_v43, %v3363_v10  ;;  %p3132_p13 = pnand %p3131_p12, %p3303_p4  ;;  %s3136_s16 = scalar_lea.vmem %s3135_s15, 4096 }
  0x20   : > { %2813 = vmatprep.mubr.msk.f32.mxu0 %vm440_vm0, %v430_v25  ;;  %v438_v29 = vadd.f32 %v436_v26, %v430_v25  ;;  %2820 = vmatprep.mubr.msk.f32.mxu1 %vm440_vm0, %v436_v26  ;;  %v958_v59 = vmul.f32 %v2645_v51, %v3369_v15  ;;  %v960_v61 = vmul.f32 %v2647_v54, %v3371_v16  ;;  %p3137_p1 = scmp.lt.s32.totalorder %s3587_s20, %s3135_s15  ;;  %p3138_p2 = scmp.lt.s32.totalorder %s3136_s16, %s3130_s28 }
  0x21   : > { %2814 = vmatmul.mubr.msk.f32.vlgmr.msra.gmra.mrb[0].mxu0 %vm440_vm0, %v431_v27  ;;  %v439_v30 = vadd.f32 %v437_v28, %v431_v27  ;;  %2821 = vmatmul.mubr.msk.f32.vlgmr.msra.gmra.mrb[0].mxu1 %vm440_vm0, %v437_v28  ;;  %v964_v62 = vmul.f32 %v2647_v54, %v3369_v15  ;;  %v966_v63 = vmul.f32 %v2645_v51, %v3371_v16  ;;  %v2667_v54 = vld [vmem:[%s3358_s18 + $0x58] sm:$0xff]  ;;  %p3133_p0 = pneg %p3132_p13 }
  0x22   : > { %2988 = vmatpush3.bf16.msra.mxu0 %v3344_v8  ;;  %2827 = vmatprep.mubr.msk.f32.mxu0 %vm440_vm0, %v438_v29  ;;  %v961_v1 = vsub.f32 %v957_v50, %v959_v53  ;;  %v967_v2 = vadd.f32 %v965_v56, %v963_v55  ;;  %v962_v5 = vsub.f32 %v958_v59, %v960_v61  ;;  %v2665_v53 = vld [vmem:[%s3358_s18 + $0x48] sm:$0xff]  ;;  %p3139_p3 = por %p3138_p2, %p3137_p1 }
  0x23   : > { %2834 = vmatprep.mubr.msk.f32.mxu1 %vm440_vm0, %v3391_v31  ;;  %v968_v6 = vadd.f32 %v966_v63, %v964_v62  ;;  %v1471_v61 = vmul.f32 %v2665_v53, %v3369_v15  ;;  %v1473_v62 = vmul.f32 %v2667_v54, %v3371_v16 }
  0x24   : > { %v969_v11 = vadd.f32 %v967_v2, %v961_v1  ;;  %p3140_p5 = pnand %p3139_p3, %p3133_p0 }
  0x25   : > { %2828 = vmatmul.mubr.msk.f32.vlgmr.msra.gmra.mrb[2].mxu0 %vm440_vm0, %v439_v30  ;;  %v970_v12 = vadd.f32 %v968_v6, %v962_v5 }
  0x26   : > { %2841 = vmatprep.mubr.msk.f32.mxu0 %vm440_vm0, %v3398_v32 }
  0xf4   : > { %v2815_v33 = vpop.f32.mrb[0].mxu0  ;;  %v2822_v34 = vpop.f32.mrb[0].mxu1 }
  0xf5   : > { %v685_v35 = vsub.f32 %v2815_v33, %v2822_v34  ;;  %v513_v36 = vpop.f32.mrb[1].mxu0  ;;  %v594_v37 = vpop.f32.mrb[1].mxu1 }
  0xf6   : > { %v684_v38 = vsub.f32 %v513_v36, %v594_v37 }
  0xf8   : > { %v2989_v39 = vpack.c.bf16 %v685_v35, %v684_v38  ;;  %v2829_v40 = vpop.f32.mrb[2].mxu0 }
  0xf9   : > { %v687_v41 = vsub.f32 %v2829_v40, %v2815_v33  ;;  %v675_v42 = vpop.f32.mrb[3].mxu0 }
  0xfa   : > { %v686_v44 = vsub.f32 %v675_v42, %v513_v36  ;;  %2990 = vmatprep.subr.bf16.mxu1 %v2989_v39 }
  0xfb   : > { %v689_v46 = vsub.f32 %v687_v41, %v2822_v34  ;;  %2992 = vmatpush3.bf16.msra.mxu1 %v2989_v39 }
  0xfc   : > { %v688_v48 = vsub.f32 %v686_v44, %v594_v37  ;;  %v2664_v44 = vld [vmem:[%s3358_s18 + $0x40] sm:$0xff] }
  0xfd   : > { %v691_v52 = vadd.f32 %v689_v46, %v685_v35 }
  0xfe   : > { %v690_v57 = vadd.f32 %v688_v48, %v684_v38  ;;  %v2993_v58 = vpack.c.bf16 %v689_v46, %v688_v48  ;;  %2835 = vmatmul.mubr.msk.f32.vlgmr.msra.gmra.mrb[2].mxu1 %vm440_vm0, %v3407_v47  ;;  %v2666_v48 = vld [vmem:[%s3358_s18 + $0x50] sm:$0xff] }
  0xff   : > { %2848 = vmatprep.mubr.msk.f32.mxu1 %vm440_vm0, %v3412_v49  ;;  %v1472_v56 = vmul.f32 %v2666_v48, %v3363_v10 }
 0x100   : > { %2994 = vmatprep.subr.bf16.mxu0 %v2993_v58  ;;  %v2997_v60 = vpack.c.bf16 %v691_v52, %v690_v57  ;;  %v1470_v52 = vmul.f32 %v2664_v44, %v3361_v9  ;;  %v1476_v57 = vmul.f32 %v2666_v48, %v3361_v9 }
 0x101   : > { %2996 = vmatpush3.bf16.msra.mxu0 %v2993_v58  ;;  %v1478_v58 = vmul.f32 %v2664_v44, %v3363_v10 }
 0x102   : > { %2998 = vmatprep.subr.bf16.mxu1 %v2997_v60  ;;  %3002 = vmatprep.subr.bf16.mxu0 %v3328_v3 }
 0x103   : > { %3000 = vmatpush3.bf16.msra.mxu1 %v2997_v60 }
 0x104   : > { %2842 = vmatmul.mubr.msk.f32.vlgmr.msra.gmra.mrb[4].mxu0 %vm440_vm0, %v3431_v0  ;;  %3006 = vmatprep.subr.bf16.mxu1 %v3339_v7 }
 0x105   : > { %3004 = vmatpush3.bf16.msra.mxu0 %v3328_v3  ;;  %2855 = vmatprep.mubr.msk.f32.mxu0 %vm440_vm0, %v961_v1  ;;  %v1477_v1 = vmul.f32 %v2667_v54, %v3369_v15 }
 0x106   : > { %2849 = vmatmul.mubr.msk.f32.vlgmr.msra.gmra.mrb[4].mxu1 %vm440_vm0, %v3437_v4  ;;  %3010 = vmatprep.subr.bf16.mxu0 %v3344_v8 }
 0x107   : > { %3008 = vmatpush3.bf16.msra.mxu1 %v3339_v7  ;;  %2862 = vmatprep.mubr.msk.f32.mxu1 %vm440_vm0, %v967_v2  ;;  %v1479_v2 = vmul.f32 %v2665_v53, %v3371_v16 }
 0x108   : > { %2856 = vmatmul.mubr.msk.f32.vlgmr.msra.gmra.mrb[6].mxu0 %vm440_vm0, %v962_v5  ;;  %v1474_v5 = vsub.f32 %v1470_v52, %v1472_v56  ;;  %v2687_v56 = vld [vmem:[%s3358_s18 + $0x78] sm:$0xff] }
 0x109   : > { %3012 = vmatpush3.bf16.msra.mxu0 %v3344_v8  ;;  %2869 = vmatprep.mubr.msk.f32.mxu0 %vm440_vm0, %v969_v11  ;;  %v1475_v11 = vsub.f32 %v1471_v61, %v1473_v62 }
 0x10a   : > { %2863 = vmatmul.mubr.msk.f32.vlgmr.msra.gmra.mrb[6].mxu1 %vm440_vm0, %v968_v6  ;;  %v1480_v6 = vadd.f32 %v1478_v58, %v1476_v57 }
 0x10b   : > { %2876 = vmatprep.mubr.msk.f32.mxu1 %vm440_vm0, %v3391_v31 }
 0x10c   : > { %2870 = vmatmul.mubr.msk.f32.vlgmr.msra.gmra.mrb[8].mxu0 %vm440_vm0, %v970_v12  ;;  %v1481_v12 = vadd.f32 %v1479_v2, %v1477_v1  ;;  %v1986_v1 = vmul.f32 %v2687_v56, %v3371_v16 }
 0x10d   : > { %2883 = vmatprep.mubr.msk.f32.mxu0 %vm440_vm0, %v3398_v32 }
 0x1d1   : > { %v2836_v13 = vpop.f32.mrb[2].mxu1 }
 0x1d2   : > { %v764_v14 = vpop.f32.mrb[3].mxu1 }
 0x1d7   : > { %v2843_v18 = vpop.f32.mrb[4].mxu0 }
 0x1d8   : > { %v936_v19 = vsub.f32 %v2836_v13, %v2843_v18  ;;  %v845_v21 = vpop.f32.mrb[5].mxu0 }
 0x1d9   : > { %v935_v22 = vsub.f32 %v764_v14, %v845_v21  ;;  %v2850_v23 = vpop.f32.mrb[4].mxu1 }
 0x1da   : > { %v942_v24 = vmul.f32 %v936_v19, %v3465_v17  ;;  %v938_v25 = vsub.f32 %v2850_v23, %v2836_v13  ;;  %v926_v26 = vpop.f32.mrb[5].mxu1  ;;  %v1482_v13 = vadd.f32 %v1480_v6, %v1474_v5 }
 0x1db   : > { %v941_v27 = vmul.f32 %v935_v22, %v3467_v20  ;;  %v937_v28 = vsub.f32 %v926_v26, %v764_v14  ;;  %v2857_v29 = vpop.f32.mrb[6].mxu0  ;;  %v1483_v14 = vadd.f32 %v1481_v12, %v1475_v11 }
 0x1dc   : > { %944 = vst [vmem:[%s3471_s24 + $0x8] sm:$0xff] %v942_v24  ;;  %v940_v30 = vsub.f32 %v938_v25, %v2843_v18  ;;  %v1043_v33 = vpop.f32.mrb[7].mxu0 }
 0x1dd   : > { %943 = vst [vmem:[%s3471_s24] sm:$0xff] %v941_v27  ;;  %v939_v34 = vsub.f32 %v937_v28, %v845_v21  ;;  %v2864_v35 = vpop.f32.mrb[6].mxu1 }
 0x1de   : > { %v946_v36 = vmul.f32 %v940_v30, %v3465_v17  ;;  %v1215_v37 = vsub.f32 %v2857_v29, %v2864_v35  ;;  %v1124_v38 = vpop.f32.mrb[7].mxu1 }
 0x1df   : > { %v945_v39 = vmul.f32 %v939_v34, %v3467_v20  ;;  %v1214_v40 = vsub.f32 %v1043_v33, %v1124_v38  ;;  %v2871_v41 = vpop.f32.mrb[8].mxu0 }
 0x1e0   : > { %2643 = vst [vmem:[%s3471_s24 + $0x18] sm:$0xff] %v946_v36  ;;  %v1217_v42 = vsub.f32 %v2871_v41, %v2857_v29  ;;  %v1205_v43 = vpop.f32.mrb[9].mxu0 }
 0x1e1   : > { %2642 = vst [vmem:[%s3471_s24 + $0x10] sm:$0xff] %v945_v39  ;;  %v3013_v45 = vpack.c.bf16 %v1215_v37, %v1214_v40  ;;  %v1216_v46 = vsub.f32 %v1205_v43, %v1043_v33 }
 0x1e2   : > { %v1219_v50 = vsub.f32 %v1217_v42, %v2864_v35 }
 0x1e3   : > { %v1218_v51 = vsub.f32 %v1216_v46, %v1124_v38  ;;  %3014 = vmatprep.subr.bf16.mxu1 %v3013_v45  ;;  %v2684_v46 = vld [vmem:[%s3358_s18 + $0x60] sm:$0xff] }
 0x1e4   : > { %v1221_v55 = vadd.f32 %v1219_v50, %v1215_v37  ;;  %3016 = vmatpush3.bf16.msra.mxu1 %v3013_v45  ;;  %v1983_v54 = vmul.f32 %v2684_v46, %v3361_v9 }
 0x1e5   : > { %v1220_v59 = vadd.f32 %v1218_v51, %v1214_v40  ;;  %v3017_v60 = vpack.c.bf16 %v1219_v50, %v1218_v51  ;;  %v2686_v51 = vld [vmem:[%s3358_s18 + $0x70] sm:$0xff] }
 0x1e6   : > { %v1985_v58 = vmul.f32 %v2686_v51, %v3363_v10 }
 0x1e7   : > { %3018 = vmatprep.subr.bf16.mxu0 %v3017_v60  ;;  %2877 = vmatmul.mubr.msk.f32.vlgmr.msra.gmra.mrb[8].mxu1 %vm440_vm0, %v3407_v47  ;;  %v3021_v63 = vpack.c.bf16 %v1221_v55, %v1220_v59  ;;  %v2685_v55 = vld [vmem:[%s3358_s18 + $0x68] sm:$0xff]  ;;  %v1989_v59 = vmul.f32 %v2686_v51, %v3361_v9  ;;  %s2712_s18 = sshll.u32 %s3200_s12, 11  ;;  %s3594_s12 = scalar_lea.sflag [#allocation3], %s378_s27 }
 0x1e8   : > { %3020 = vmatpush3.bf16.msra.mxu0 %v3017_v60  ;;  %2890 = vmatprep.mubr.msk.f32.mxu1 %vm440_vm0, %v3412_v49  ;;  %v1991_v60 = vmul.f32 %v2684_v46, %v3363_v10  ;;  %v1987_v9 = vsub.f32 %v1983_v54, %v1985_v58  ;;  %s3585_s26 = scalar_lea.hbm %s3649_s9, %s2712_s18 }
 0x1e9   : > { %3022 = vmatprep.subr.bf16.mxu1 %v3021_v63  ;;  %3026 = vmatprep.subr.bf16.mxu0 %v3328_v3 }
 0x1ea   : > { %3024 = vmatpush3.bf16.msra.mxu1 %v3021_v63  ;;  %v1984_v63 = vmul.f32 %v2685_v55, %v3369_v15  ;;  %v1993_v10 = vadd.f32 %v1991_v60, %v1989_v59 }
 0x1eb   : > { %2884 = vmatmul.mubr.msk.f32.vlgmr.msra.gmra.mrb[10].mxu0 %vm440_vm0, %v3431_v0  ;;  %3030 = vmatprep.subr.bf16.mxu1 %v3339_v7 }
 0x1ec   : > { %3028 = vmatpush3.bf16.msra.mxu0 %v3328_v3  ;;  %2897 = vmatprep.mubr.msk.f32.mxu0 %vm440_vm0, %v1474_v5  ;;  %v1990_v5 = vmul.f32 %v2687_v56, %v3369_v15  ;;  %v1995_v15 = vadd.f32 %v1993_v10, %v1987_v9 }
 0x1ed   : > { %2891 = vmatmul.mubr.msk.f32.vlgmr.msra.gmra.mrb[10].mxu1 %vm440_vm0, %v3437_v4  ;;  %3034 = vmatprep.subr.bf16.mxu0 %v3344_v8 }
 0x1ee   : > { %3032 = vmatpush3.bf16.msra.mxu1 %v3339_v7  ;;  %2904 = vmatprep.mubr.msk.f32.mxu1 %vm440_vm0, %v1480_v6  ;;  %v1992_v6 = vmul.f32 %v2685_v55, %v3371_v16 }
 0x1ef   : > { %2898 = vmatmul.mubr.msk.f32.vlgmr.msra.gmra.mrb[12].mxu0 %vm440_vm0, %v1475_v11  ;;  %v1988_v11 = vsub.f32 %v1984_v63, %v1986_v1 }
 0x1f0   : > { %3036 = vmatpush3.bf16.msra.mxu0 %v3344_v8  ;;  %2911 = vmatprep.mubr.msk.f32.mxu0 %vm440_vm0, %v1482_v13 }
 0x1f1   : > { %2905 = vmatmul.mubr.msk.f32.vlgmr.msra.gmra.mrb[12].mxu1 %vm440_vm0, %v1481_v12  ;;  %v1994_v12 = vadd.f32 %v1992_v6, %v1990_v5 }
 0x1f2   : > { %2918 = vmatprep.mubr.msk.f32.mxu1 %vm440_vm0, %v3391_v31 }
 0x1f3   : > { %2912 = vmatmul.mubr.msk.f32.vlgmr.msra.gmra.mrb[14].mxu0 %vm440_vm0, %v1483_v14  ;;  %v1996_v16 = vadd.f32 %v1994_v12, %v1988_v11 }
 0x1f4   : > { %2925 = vmatprep.mubr.msk.f32.mxu0 %vm440_vm0, %v3398_v32 }
 0x2ba   : > { %v2878_v18 = vpop.f32.mrb[8].mxu1 }
 0x2bb   : > { %v1288_v19 = vpop.f32.mrb[9].mxu1 }
 0x2be   : > { %v2885_v21 = vpop.f32.mrb[10].mxu0 }
 0x2bf   : > { %v1448_v22 = vsub.f32 %v2878_v18, %v2885_v21  ;;  %v1363_v23 = vpop.f32.mrb[11].mxu0 }
 0x2c0   : > { %v1447_v24 = vsub.f32 %v1288_v19, %v1363_v23  ;;  %v2892_v25 = vpop.f32.mrb[10].mxu1 }
 0x2c1   : > { %v1454_v26 = vmul.f32 %v1448_v22, %v3465_v17  ;;  %v1450_v27 = vsub.f32 %v2892_v25, %v2878_v18  ;;  %v1438_v28 = vpop.f32.mrb[11].mxu1 }
 0x2c2   : > { %v1453_v29 = vmul.f32 %v1447_v24, %v3467_v20  ;;  %v1449_v30 = vsub.f32 %v1438_v28, %v1288_v19  ;;  %v2899_v33 = vpop.f32.mrb[12].mxu0 }
 0x2c3   : > { %2661 = vst [vmem:[%s3471_s24 + $0x28] sm:$0xff] %v1454_v26  ;;  %v1452_v34 = vsub.f32 %v1450_v27, %v2885_v21  ;;  %v1556_v35 = vpop.f32.mrb[13].mxu0 }
 0x2c4   : > { %2660 = vst [vmem:[%s3471_s24 + $0x20] sm:$0xff] %v1453_v29  ;;  %v1451_v36 = vsub.f32 %v1449_v30, %v1363_v23  ;;  %v2906_v37 = vpop.f32.mrb[12].mxu1 }
 0x2c5   : > { %v1459_v38 = vmul.f32 %v1452_v34, %v3465_v17  ;;  %v1728_v39 = vsub.f32 %v2899_v33, %v2906_v37  ;;  %v1637_v40 = vpop.f32.mrb[13].mxu1 }
 0x2c6   : > { %v1458_v41 = vmul.f32 %v1451_v36, %v3467_v20  ;;  %v1727_v42 = vsub.f32 %v1556_v35, %v1637_v40  ;;  %v2913_v43 = vpop.f32.mrb[14].mxu0 }
 0x2c7   : > { %2663 = vst [vmem:[%s3471_s24 + $0x38] sm:$0xff] %v1459_v38  ;;  %v1730_v44 = vsub.f32 %v2913_v43, %v2899_v33  ;;  %v1718_v45 = vpop.f32.mrb[15].mxu0 }
 0x2c8   : > { %2662 = vst [vmem:[%s3471_s24 + $0x30] sm:$0xff] %v1458_v41  ;;  %v3037_v48 = vpack.c.bf16 %v1728_v39, %v1727_v42  ;;  %v1729_v50 = vsub.f32 %v1718_v45, %v1556_v35 }
 0x2c9   : > { %v1732_v52 = vsub.f32 %v1730_v44, %v2906_v37 }
 0x2ca   : > { %v1731_v53 = vsub.f32 %v1729_v50, %v1637_v40  ;;  %3038 = vmatprep.subr.bf16.mxu1 %v3037_v48 }
 0x2cb   : > { %v1734_v57 = vadd.f32 %v1732_v52, %v1728_v39  ;;  %3040 = vmatpush3.bf16.msra.mxu1 %v3037_v48 }
 0x2cc   : > { %v1733_v61 = vadd.f32 %v1731_v53, %v1727_v42  ;;  %v3041_v62 = vpack.c.bf16 %v1732_v52, %v1731_v53 }
 0x2ce   : > { %3042 = vmatprep.subr.bf16.mxu0 %v3041_v62  ;;  %2919 = vmatmul.mubr.msk.f32.vlgmr.msra.gmra.mrb[14].mxu1 %vm440_vm0, %v3407_v47  ;;  %v3045_v2 = vpack.c.bf16 %v1734_v57, %v1733_v61 }
 0x2cf   : > { %3044 = vmatpush3.bf16.msra.mxu0 %v3041_v62  ;;  %2932 = vmatprep.mubr.msk.f32.mxu1 %vm440_vm0, %v3412_v49 }
 0x2d0   : > { %3046 = vmatprep.subr.bf16.mxu1 %v3045_v2  ;;  %3050 = vmatprep.subr.bf16.mxu0 %v3328_v3 }
 0x2d1   : > { %3048 = vmatpush3.bf16.msra.mxu1 %v3045_v2 }
 0x2d2   : > { %2926 = vmatmul.mubr.msk.f32.vlgmr.msra.gmra.mrb[16].mxu0 %vm440_vm0, %v3431_v0  ;;  %3054 = vmatprep.subr.bf16.mxu1 %v3339_v7 }
 0x2d3   : > { %3052 = vmatpush3.bf16.msra.mxu0 %v3328_v3  ;;  %2939 = vmatprep.mubr.msk.f32.mxu0 %vm440_vm0, %v1987_v9 }
 0x2d4   : > { %2933 = vmatmul.mubr.msk.f32.vlgmr.msra.gmra.mrb[16].mxu1 %vm440_vm0, %v3437_v4  ;;  %3058 = vmatprep.subr.bf16.mxu0 %v3344_v8 }
 0x2d5   : > { %3056 = vmatpush3.bf16.msra.mxu1 %v3339_v7  ;;  %2946 = vmatprep.mubr.msk.f32.mxu1 %vm440_vm0, %v1993_v10 }
 0x2d6   : > { %2940 = vmatmul.mubr.msk.f32.vlgmr.msra.gmra.mrb[18].mxu0 %vm440_vm0, %v1988_v11 }
 0x2d7   : > { %3060 = vmatpush3.bf16.msra.mxu0 %v3344_v8  ;;  %2953 = vmatprep.mubr.msk.f32.mxu0 %vm440_vm0, %v1995_v15 }
 0x2d8   : > { %2947 = vmatmul.mubr.msk.f32.vlgmr.msra.gmra.mrb[18].mxu1 %vm440_vm0, %v1994_v12 }
 0x2d9   : > { %2960 = vmatprep.mubr.msk.f32.mxu1 %vm440_vm0, %v3391_v31 }
 0x2da   : > { %2954 = vmatmul.mubr.msk.f32.vlgmr.msra.gmra.mrb[20].mxu0 %vm440_vm0, %v1996_v16 }
 0x2db   : > { %2967 = vmatprep.mubr.msk.f32.mxu0 %vm440_vm0, %v3398_v32 }
 0x3a1   : > { %v2920_v3 = vpop.f32.mrb[14].mxu1 }
 0x3a2   : > { %v1801_v7 = vpop.f32.mrb[15].mxu1 }
 0x3a5   : > { %v2927_v13 = vpop.f32.mrb[16].mxu0 }
 0x3a6   : > { %v1961_v14 = vsub.f32 %v2920_v3, %v2927_v13  ;;  %v1876_v18 = vpop.f32.mrb[17].mxu0 }
 0x3a7   : > { %v1960_v8 = vsub.f32 %v1801_v7, %v1876_v18  ;;  %v2934_v19 = vpop.f32.mrb[16].mxu1 }
 0x3a8   : > { %v1967_v21 = vmul.f32 %v1961_v14, %v3465_v17  ;;  %v1963_v22 = vsub.f32 %v2934_v19, %v2920_v3  ;;  %v1951_v23 = vpop.f32.mrb[17].mxu1 }
 0x3a9   : > { %v1966_v31 = vmul.f32 %v1960_v8, %v3467_v20  ;;  %v1962_v24 = vsub.f32 %v1951_v23, %v1801_v7  ;;  %v2941_v25 = vpop.f32.mrb[18].mxu0 }
 0x3aa   : > { %2681 = vst [vmem:[%s3471_s24 + $0x48] sm:$0xff] %v1967_v21  ;;  %v1965_v32 = vsub.f32 %v1963_v22, %v2927_v13  ;;  %v2069_v26 = vpop.f32.mrb[19].mxu0 }
 0x3ab   : > { %2680 = vst [vmem:[%s3471_s24 + $0x40] sm:$0xff] %v1966_v31  ;;  %v1964_v27 = vsub.f32 %v1962_v24, %v1876_v18  ;;  %v2948_v28 = vpop.f32.mrb[18].mxu1 }
 0x3ac   : > { %v1972_v29 = vmul.f32 %v1965_v32, %v3465_v17  ;;  %v2241_v30 = vsub.f32 %v2941_v25, %v2948_v28  ;;  %v2150_v33 = vpop.f32.mrb[19].mxu1 }
 0x3ad   : > { %v1971_v34 = vmul.f32 %v1964_v27, %v3467_v20  ;;  %v2240_v35 = vsub.f32 %v2069_v26, %v2150_v33  ;;  %v2955_v36 = vpop.f32.mrb[20].mxu0 }
 0x3ae   : > { %2683 = vst [vmem:[%s3471_s24 + $0x58] sm:$0xff] %v1972_v29  ;;  %v2243_v37 = vsub.f32 %v2955_v36, %v2941_v25  ;;  %v2231_v38 = vpop.f32.mrb[21].mxu0 }
 0x3af   : > { %2682 = vst [vmem:[%s3471_s24 + $0x50] sm:$0xff] %v1971_v34  ;;  %v3061_v39 = vpack.c.bf16 %v2241_v30, %v2240_v35  ;;  %v2242_v40 = vsub.f32 %v2231_v38, %v2069_v26 }
 0x3b0   : > { %v2245_v41 = vsub.f32 %v2243_v37, %v2948_v28 }
 0x3b1   : > { %v2244_v42 = vsub.f32 %v2242_v40, %v2150_v33  ;;  %3062 = vmatprep.subr.bf16.mxu1 %v3061_v39 }
 0x3b2   : > { %v2247_v43 = vadd.f32 %v2245_v41, %v2241_v30  ;;  %3064 = vmatpush3.bf16.msra.mxu1 %v3061_v39 }
 0x3b3   : > { %v2246_v44 = vadd.f32 %v2244_v42, %v2240_v35  ;;  %v3065_v45 = vpack.c.bf16 %v2245_v41, %v2244_v42 }
 0x3b5   : > { %3066 = vmatprep.subr.bf16.mxu0 %v3065_v45  ;;  %2961 = vmatmul.mubr.msk.f32.vlgmr.msra.gmra.mrb[20].mxu1 %vm440_vm0, %v3407_v47  ;;  %v3069_v46 = vpack.c.bf16 %v2247_v43, %v2246_v44 }
 0x3b6   : > { %3068 = vmatpush3.bf16.msra.mxu0 %v3065_v45  ;;  %2974 = vmatprep.mubr.msk.f32.mxu1 %vm440_vm0, %v3412_v49 }
 0x3b7   : > { %3070 = vmatprep.subr.bf16.mxu1 %v3069_v46 }
 0x3b8   : > { %3072 = vmatpush3.bf16.msra.mxu1 %v3069_v46 }
 0x3b9   : > { %2968 = vmatmul.mubr.msk.f32.vlgmr.msra.gmra.mrb[22].mxu0 %vm440_vm0, %v3431_v0 }
 0x3bb   : > { %2975 = vmatmul.mubr.msk.f32.vlgmr.msra.gmra.mrb[22].mxu1 %vm440_vm0, %v3437_v4 }
 0x488   : > { %v2962_v48 = vpop.f32.mrb[20].mxu1 }
 0x489   : > { %v2314_v50 = vpop.f32.mrb[21].mxu1 }
 0x48c   : > { %v2969_v47 = vpop.f32.mrb[22].mxu0 }
 0x48d   : > { %v2474_v51 = vsub.f32 %v2962_v48, %v2969_v47  ;;  %v2389_v52 = vpop.f32.mrb[23].mxu0 }
 0x48e   : > { %v2473_v53 = vsub.f32 %v2314_v50, %v2389_v52  ;;  %v2976_v54 = vpop.f32.mrb[22].mxu1 }
 0x48f   : > { %v2480_v49 = vmul.f32 %v2474_v51, %v3465_v17  ;;  %v2476_v55 = vsub.f32 %v2976_v54, %v2962_v48  ;;  %v2464_v56 = vpop.f32.mrb[23].mxu1 }
 0x490   : > { %v2479_v0 = vmul.f32 %v2473_v53, %v3467_v20  ;;  %v2475_v57 = vsub.f32 %v2464_v56, %v2314_v50 }
 0x491   : > { %2701 = vst [vmem:[%s3471_s24 + $0x68] sm:$0xff] %v2480_v49  ;;  %v2478_v4 = vsub.f32 %v2476_v55, %v2969_v47 }
 0x492   : > { %2700 = vst [vmem:[%s3471_s24 + $0x60] sm:$0xff] %v2479_v0  ;;  %v2477_v58 = vsub.f32 %v2475_v57, %v2389_v52 }
 0x493   : > { %v2485_v59 = vmul.f32 %v2478_v4, %v3465_v17 }
 0x494   : > { %v2484_v60 = vmul.f32 %v2477_v58, %v3467_v20 }
 0x495   : > { %2703 = vst [vmem:[%s3471_s24 + $0x78] sm:$0xff] %v2485_v59 }
 0x496   : > { %2702 = vst [vmem:[%s3471_s24 + $0x70] sm:$0xff] %v2484_v60 }
 0x497   : > { %3143 = shalt.err (!%p3140_p5)
}
 0x498   : > { %s3144_s27 = scalar_lea.hbm %s3585_s26, 2048  ;;  %s3148_s23 = scalar_lea.hbm %s3649_s9, 4096 }
 0x499   : > { %p3145_p6 = scmp.ne.s32.totalorder %s3585_s26, %s3144_s27  ;;  %p3149_p10 = scmp.lt.u32.totalorder %s3585_s26, %s3649_s9 }
 0x49a   : > { %p3150_p11 = scmp.lt.u32.totalorder %s3148_s23, %s3144_s27  ;;  %p3152_p13 = scmp.lt.u32.totalorder %s3144_s27, %s3585_s26 }
 0x49b   : > { %p3146_p7 = pnand %p3145_p6, %p3303_p4 }
 0x49c   : > { %p3151_p12 = por %p3150_p11, %p3149_p10 }
 0x49d   : > { %p3147_p9 = pneg %p3146_p7 }
 0x49e   : > { %p3153_p0 = por %p3152_p13, %p3151_p12 }
 0x4a0   : > { %p3154_p1 = pnand %p3153_p0, %p3147_p9 }
 0x4a2   : > { %3157 = shalt.err (!%p3154_p1)
}
 0x4a3   : > { %s3211_s28 = smov 128   ;;  %s3212_s15 = smov 8  }
 0x4a4   : > { %3073 = dma.vmem_to_hbm [thread:$0]  (%p3303_p4), %s3587_s20, 2048, %s3585_s26, %s3594_s12, %s3211_s28, %s3211_s28, %s3212_s15  }
 0x4a5 PF: > { %p3079_p2 = scmp.ge.s32.totalorder %s3208_s14, 2  ;;  %s2520_s16 = sand.u32 1, %s3188_s30  }
 0x4a6   : > { %s2521_s27 = scalar_lea.sflag [#allocation3], %s2520_s16 }
 0x4a7   : > { %p3076_p3 = pnand %p3079_p2, %p3310_p8 }
 0x4a9   : > { %3183 = dma.done.wait (!%p3076_p3), %s2521_s27, 2048  }
 0x4aa   : > { %3185 = vsyncadd (!%p3076_p3), %s2521_s27, 4294965248  ;;  %s22_s14 = sadd.s32 1, %s3208_s14   ;;  %s3652_s30 = smov %s3192_s10 }
 0x4ab   : > { %p19_p5 = scmp.ge.s32.totalorder %s22_s14, 4   ;;  %s3653_s10 = smov %s3196_s11 }
 0x4ac   : > { %s3654_s11 = smov %s3316_s22  ;;  %s3655_s12 = smov %s3204_s13 }
 0x4ad   : > { %s3656_s13 = smov %s3658_s17  ;;  %21 = sbr.rel (!%p19_p5) target bundleno = 4 (0x4), region = 111 }
 0x4b4   :  { %2526 = vsyncpa [#allocation3], 1 }
 0x4b5   :  { %2528 = vsyncpa [#allocation3 + $0x1], 1 }

</bundles_post_ra>
